<compile_context>
chip_gen: v7x
topology: tpu7x:2x2x1
jax: 0.10.0
libtpu: 0.0.40
codegen_flags: <defaults>
</compile_context>

<pallas_src>
import jax
import jax.numpy as jnp
from jax import lax
from jax.experimental import pallas as pl
from jax.experimental.pallas import tpu as pltpu

LN_EPS = 1e-5  # PyTorch nn.LayerNorm default


def _round_up(n: int, m: int) -> int:
    return ((n + m - 1) // m) * m


def _pick_hidden_chunk(H: int, target: int) -> int:
    """Largest chunk <= target that divides H, preferring multiples of 128 (lanes)."""
    if H <= target:
        return H
    c = (target // 128) * 128
    while c >= 128:
        if H % c == 0:
            return c
        c -= 128
    return H  # no friendly divisor -> keep H unchunked


def _make_ffn_kernel(hc: int, n_chunks: int):
    def ffn_kernel(x_ref, w1_ref, b1_ref, w2_ref, b2_ref, o_ref, acc_ref):
        # LayerNorm in f32 over the true feature dim (affine folded into W1/b1).
        x = x_ref[...].astype(jnp.float32)                          # (tm, D)
        mean = jnp.mean(x, axis=-1, keepdims=True)
        var = jnp.mean(jnp.square(x - mean), axis=-1, keepdims=True)
        xn = ((x - mean) * lax.rsqrt(var + LN_EPS)).astype(w1_ref.dtype)  # bf16 MXU input

        # f32 accumulator initialized with the second bias.
        acc_ref[...] = jnp.broadcast_to(b2_ref[...], acc_ref.shape)

        # Hidden dim in chunks of hc: matmul1 -> SiLU -> matmul2 accumulate, so the
        # (tm, H) f32 activation is never fully materialized.
        def body(c, carry):
            start = pl.multiple_of(c * hc, hc)
            h = jnp.dot(xn, w1_ref[:, pl.ds(start, hc)],
                        preferred_element_type=jnp.float32) + b1_ref[:, pl.ds(start, hc)]
            # SiLU: both transcendental steps stay on the EUP slot.
            s = jnp.exp(-h)
            h = h * pl.reciprocal(1.0 + s, approx=True)
            acc_ref[...] += jnp.dot(h.astype(w2_ref.dtype), w2_ref[pl.ds(start, hc), :],
                                    preferred_element_type=jnp.float32)
            return carry

        lax.fori_loop(0, n_chunks, body, 0, unroll=True)

        # TODO(synk): dropout omitted — inference semantics (identity in eval mode).
        o_ref[...] = acc_ref[...].astype(o_ref.dtype)

    return ffn_kernel


def feed_forward_module(x, gamma, beta, w1, b1, w2, b2, *,
                        row_tile=512, hidden_chunk=512, matmul_dtype=jnp.bfloat16):
    """x: (B, S, D). Weights given as (in, out) matrices. Returns (B, S, D)."""
    B, S, D = x.shape
    H = w1.shape[1]
    M = B * S

    # Fold the LayerNorm affine into the first linear (valid: dropout is identity in
    # eval mode):  (xn*gamma + beta) @ W1 + b1 == xn @ (diag(gamma)@W1) + (beta@W1 + b1)
    w1f32 = w1.astype(jnp.float32)
    w1_folded = (gamma.astype(jnp.float32)[:, None] * w1f32).astype(matmul_dtype)  # (D, H)
    b1_folded = (beta.astype(jnp.float32) @ w1f32
                 + b1.astype(jnp.float32)).reshape(1, H)                            # (1, H) f32
    w2_c = w2.astype(matmul_dtype)                                                  # (H, D)
    b2_2 = b2.astype(jnp.float32).reshape(1, D)                                     # (1, D) f32

    # Row tile: large enough to amortize per-step overhead, multiple of 8, and capped
    # so there are >= 2 grid steps (parallel axis spans both v7x TensorCores).
    tm = min(int(row_tile), _round_up(M, 8))
    if M > 8:
        tm = min(tm, _round_up((M + 1) // 2, 8))
    tm = max(8, _round_up(tm, 8))
    Mp = _round_up(M, tm)

    x2d = x.reshape(M, D)
    if Mp != M:
        x2d = jnp.pad(x2d, ((0, Mp - M), (0, 0)))  # zero rows -> finite values, sliced off

    hc = _pick_hidden_chunk(H, int(hidden_chunk))
    n_chunks = H // hc

    # VMEM budget: single-buffered weights + double-buffered x/out tiles + f32
    # accumulator + per-chunk intermediates + headroom for compiler scratch.
    # Capped at 48 MiB so we never claim all of v7x's 64 MiB per-TC VMEM.
    it = lambda dt: jnp.dtype(dt).itemsize
    need = ((D * H + H * D) * it(matmul_dtype) + (H + D) * 4        # weights/biases (x1)
            + 2 * tm * D * (it(x2d.dtype) + it(x.dtype))            # x / out double buffers
            + tm * D * 4                                            # f32 accumulator
            + 4 * tm * hc * 4                                       # chunk intermediates
            + (8 << 20))                                            # internal scratch headroom
    vmem_limit = int(min(max(need, 32 << 20), 48 << 20))

    const = pl.Buffered(1)  # constant blocks: single-buffer, no re-fetch benefit from 2

    out = pl.pallas_call(
        _make_ffn_kernel(hc, n_chunks),
        out_shape=jax.ShapeDtypeStruct((Mp, D), x.dtype),
        grid_spec=pltpu.PrefetchScalarGridSpec(
            num_scalar_prefetch=0,
            grid=(Mp // tm,),
            in_specs=[
                pl.BlockSpec((tm, D), lambda i: (i, 0)),                          # x rows
                pl.BlockSpec((D, H), lambda i: (0, 0), pipeline_mode=const),      # W1 (folded)
                pl.BlockSpec((1, H), lambda i: (0, 0), pipeline_mode=const),      # b1 (folded)
                pl.BlockSpec((H, D), lambda i: (0, 0), pipeline_mode=const),      # W2
                pl.BlockSpec((1, D), lambda i: (0, 0), pipeline_mode=const),      # b2
            ],
            out_specs=pl.BlockSpec((tm, D), lambda i: (i, 0)),
            scratch_shapes=[pltpu.VMEM((tm, D), jnp.float32)],
        ),
        compiler_params=pltpu.CompilerParams(
            dimension_semantics=("parallel",),
            vmem_limit_bytes=vmem_limit,
        ),
    )(x2d, w1_folded, b1_folded, w2_c, b2_2)

    return out[:M].reshape(B, S, D)


def reference(x, gamma, beta, w1, b1, w2, b2):
    xf = x.astype(jnp.float32)
    mean = jnp.mean(xf, axis=-1, keepdims=True)
    var = jnp.mean(jnp.square(xf - mean), axis=-1, keepdims=True)
    xn = (xf - mean) * lax.rsqrt(var + LN_EPS) * gamma + beta
    h = xn @ w1 + b1
    h = h * jax.nn.sigmoid(h)
    y = h @ w2 + b2
    return y.astype(x.dtype)


if __name__ == "__main__":
    # Small shapes consistent with the module: encoder_dim=32, expansion_factor=4
    B, S, D, E = 2, 8, 32, 4
    H = D * E

    key = jax.random.PRNGKey(0)
    kx, kg, kb, kw1, kb1, kw2, kb2 = jax.random.split(key, 7)

    x = jax.random.normal(kx, (B, S, D), dtype=jnp.float32)

    # Deterministic synthetic parameters (PyTorch Linear is y = x @ W.T + b;
    # we store the already-transposed (in, out) matrices for direct matmul).
    gamma = 1.0 + 0.01 * jax.random.normal(kg, (D,), dtype=jnp.float32)
    beta = 0.01 * jax.random.normal(kb, (D,), dtype=jnp.float32)
    w1 = jax.random.normal(kw1, (D, H), dtype=jnp.float32) / jnp.sqrt(D)
    b1 = 0.01 * jax.random.normal(kb1, (H,), dtype=jnp.float32)
    w2 = jax.random.normal(kw2, (H, D), dtype=jnp.float32) / jnp.sqrt(H)
    b2 = 0.01 * jax.random.normal(kb2, (D,), dtype=jnp.float32)

    out = feed_forward_module(x, gamma, beta, w1, b1, w2, b2)
    out = jax.block_until_ready(out)

    ref = reference(x, gamma, beta, w1, b1, w2, b2)
    assert out.shape == (B, S, D)
    # bf16 matmul inputs + approx EUP reciprocal -> looser tolerance than pure f32.
    assert jnp.allclose(out, ref, atol=5e-2, rtol=5e-2), "mismatch vs reference"

    print("KERNEL_OK")
</pallas_src>

<mosaic_0001>
module attributes {stable_mosaic.version = 11 : i64} {
  func.func @ffn_kernel(%arg0: i32, %arg1: memref<8x32xf32, #tpu.memory_space<vmem>>, %arg2: memref<32x128xbf16, #tpu.memory_space<vmem>>, %arg3: memref<1x128xf32, #tpu.memory_space<vmem>>, %arg4: memref<128x32xbf16, #tpu.memory_space<vmem>>, %arg5: memref<1x32xf32, #tpu.memory_space<vmem>>, %arg6: memref<8x32xf32, #tpu.memory_space<vmem>>, %arg7: memref<8x32xf32, #tpu.memory_space<vmem>>) attributes {dimension_semantics = [#tpu.dimension_semantics<parallel>], iteration_bounds = array<i64: 2>, scalar_prefetch = 0 : i64, scratch_operands = 1 : i64, tpu.core_type = #tpu.core_type<tc>, window_params = [{transform_indices = @transform_0, window_bounds = array<i64: 8, 32>}, {pipeline_mode = #tpu.pipeline_mode<synchronous>, transform_indices = @transform_1, window_bounds = array<i64: 32, 128>}, {pipeline_mode = #tpu.pipeline_mode<synchronous>, transform_indices = @transform_2, window_bounds = array<i64: 1, 128>}, {pipeline_mode = #tpu.pipeline_mode<synchronous>, transform_indices = @transform_3, window_bounds = array<i64: 128, 32>}, {pipeline_mode = #tpu.pipeline_mode<synchronous>, transform_indices = @transform_4, window_bounds = array<i64: 1, 32>}, {transform_indices = @transform_5, window_bounds = array<i64: 8, 32>}]} {
    %c0 = arith.constant 0 : index
    %c0_0 = arith.constant 0 : index
    %0 = vector.load %arg1[%c0, %c0_0] : memref<8x32xf32, #tpu.memory_space<vmem>>, vector<8x32xf32>
    %cst = arith.constant dense<0.000000e+00> : vector<8xf32>
    %1 = vector.multi_reduction <add>, %0, %cst [1] : vector<8x32xf32> to vector<8xf32>
    %2 = vector.shape_cast %1 : vector<8xf32> to vector<8x1xf32>
    %cst_1 = arith.constant 3.200000e+01 : f32
    %3 = vector.broadcast %cst_1 : f32 to vector<8x1xf32>
    %4 = arith.divf %2, %3 : vector<8x1xf32>
    %5 = vector.broadcast %4 : vector<8x1xf32> to vector<8x32xf32>
    %6 = arith.subf %0, %5 : vector<8x32xf32>
    %7 = arith.mulf %6, %6 : vector<8x32xf32>
    %cst_2 = arith.constant dense<0.000000e+00> : vector<8xf32>
    %8 = vector.multi_reduction <add>, %7, %cst_2 [1] : vector<8x32xf32> to vector<8xf32>
    %9 = vector.shape_cast %8 : vector<8xf32> to vector<8x1xf32>
    %cst_3 = arith.constant 3.200000e+01 : f32
    %10 = vector.broadcast %cst_3 : f32 to vector<8x1xf32>
    %11 = arith.divf %9, %10 : vector<8x1xf32>
    %12 = vector.broadcast %4 : vector<8x1xf32> to vector<8x32xf32>
    %13 = arith.subf %0, %12 : vector<8x32xf32>
    %cst_4 = arith.constant 9.99999974E-6 : f32
    %14 = vector.broadcast %cst_4 : f32 to vector<8x1xf32>
    %15 = arith.addf %11, %14 : vector<8x1xf32>
    %16 = math.rsqrt %15 : vector<8x1xf32>
    %17 = vector.broadcast %16 : vector<8x1xf32> to vector<8x32xf32>
    %18 = arith.mulf %13, %17 : vector<8x32xf32>
    %19 = arith.truncf %18 : vector<8x32xf32> to vector<8x32xbf16>
    %c0_5 = arith.constant 0 : index
    %c0_6 = arith.constant 0 : index
    %20 = vector.load %arg5[%c0_5, %c0_6] : memref<1x32xf32, #tpu.memory_space<vmem>>, vector<1x32xf32>
    %21 = vector.shape_cast %20 : vector<1x32xf32> to vector<1x32xf32>
    %22 = vector.broadcast %21 : vector<1x32xf32> to vector<8x32xf32>
    %c0_7 = arith.constant 0 : index
    %c0_8 = arith.constant 0 : index
    %23 = vector.load %arg7[%c0_7, %c0_8] : memref<8x32xf32, #tpu.memory_space<vmem>>, vector<8x32xf32>
    tpu.vector_store %arg7[%c0_7, %c0_8], %22 {strides = array<i32>} : memref<8x32xf32, #tpu.memory_space<vmem>>, vector<8x32xf32>,
    %c0_i32 = arith.constant 0 : i32
    %c128_i32 = arith.constant 128 : i32
    %24 = arith.muli %c0_i32, %c128_i32 : i32
    %25 = tpu.assume_multiple %24, 128 : i32
    %c0_9 = arith.constant 0 : index
    %26 = arith.index_cast %25 : i32 to index
    %27 = vector.load %arg2[%c0_9, %26] : memref<32x128xbf16, #tpu.memory_space<vmem>>, vector<32x128xbf16>
    %cst_10 = arith.constant dense<0.000000e+00> : vector<8x128xf32>
    %28 = tpu.matmul %19, %27, %cst_10 {dimension_numbers = #tpu.dot_dimension_numbers<[1], [0], [0], [1], [0, 0, 1, 1], [], []>} : vector<8x32xbf16>, vector<32x128xbf16>, vector<8x128xf32> -> vector<8x128xf32>
    %c0_11 = arith.constant 0 : index
    %29 = arith.index_cast %25 : i32 to index
    %30 = vector.load %arg3[%c0_11, %29] : memref<1x128xf32, #tpu.memory_space<vmem>>, vector<1x128xf32>
    %31 = vector.broadcast %30 : vector<1x128xf32> to vector<8x128xf32>
    %32 = arith.addf %28, %31 : vector<8x128xf32>
    %cst_12 = arith.constant 0.000000e+00 : f32
    %33 = vector.broadcast %cst_12 : f32 to vector<8x128xf32>
    %34 = arith.subf %33, %32 : vector<8x128xf32>
    %35 = math.exp %34 : vector<8x128xf32>
    %cst_13 = arith.constant 1.000000e+00 : f32
    %36 = vector.broadcast %cst_13 : f32 to vector<8x128xf32>
    %37 = arith.addf %36, %35 : vector<8x128xf32>
    %38 = tpu.reciprocal %37 {approx = true} : vector<8x128xf32> -> vector<8x128xf32>
    %39 = arith.mulf %32, %38 : vector<8x128xf32>
    %c0_14 = arith.constant 0 : index
    %c0_15 = arith.constant 0 : index
    %40 = vector.load %arg7[%c0_14, %c0_15] : memref<8x32xf32, #tpu.memory_space<vmem>>, vector<8x32xf32>
    %41 = arith.truncf %39 : vector<8x128xf32> to vector<8x128xbf16>
    %42 = arith.index_cast %25 : i32 to index
    %c0_16 = arith.constant 0 : index
    %43 = vector.load %arg4[%42, %c0_16] : memref<128x32xbf16, #tpu.memory_space<vmem>>, vector<128x32xbf16>
    %cst_17 = arith.constant dense<0.000000e+00> : vector<8x32xf32>
    %44 = tpu.matmul %41, %43, %cst_17 {dimension_numbers = #tpu.dot_dimension_numbers<[1], [0], [0], [1], [0, 0, 1, 1], [], []>} : vector<8x128xbf16>, vector<128x32xbf16>, vector<8x32xf32> -> vector<8x32xf32>
    %45 = arith.addf %40, %44 : vector<8x32xf32>
    %c0_18 = arith.constant 0 : index
    %c0_19 = arith.constant 0 : index
    %46 = vector.load %arg7[%c0_18, %c0_19] : memref<8x32xf32, #tpu.memory_space<vmem>>, vector<8x32xf32>
    tpu.vector_store %arg7[%c0_18, %c0_19], %45 {strides = array<i32>} : memref<8x32xf32, #tpu.memory_space<vmem>>, vector<8x32xf32>,
    %c1_i32 = arith.constant 1 : i32
    %c0_20 = arith.constant 0 : index
    %c0_21 = arith.constant 0 : index
    %47 = vector.load %arg7[%c0_20, %c0_21] : memref<8x32xf32, #tpu.memory_space<vmem>>, vector<8x32xf32>
    %c0_22 = arith.constant 0 : index
    %c0_23 = arith.constant 0 : index
    %48 = vector.load %arg6[%c0_22, %c0_23] : memref<8x32xf32, #tpu.memory_space<vmem>>, vector<8x32xf32>
    tpu.vector_store %arg6[%c0_22, %c0_23], %47 {strides = array<i32>} : memref<8x32xf32, #tpu.memory_space<vmem>>, vector<8x32xf32>,
    return
  }
  func.func @transform_0(%arg0: i32) -> (i32, i32) {
    %c0_i32 = arith.constant 0 : i32
    %c0_i32_0 = arith.constant 0 : i32
    return %arg0, %c0_i32 : i32, i32
  }
  func.func @transform_1(%arg0: i32) -> (i32, i32) {
    %c0_i32 = arith.constant 0 : i32
    %c0_i32_0 = arith.constant 0 : i32
    %c0_i32_1 = arith.constant 0 : i32
    return %c0_i32, %c0_i32_0 : i32, i32
  }
  func.func @transform_2(%arg0: i32) -> (i32, i32) {
    %c0_i32 = arith.constant 0 : i32
    %c0_i32_0 = arith.constant 0 : i32
    %c0_i32_1 = arith.constant 0 : i32
    return %c0_i32, %c0_i32_0 : i32, i32
  }
  func.func @transform_3(%arg0: i32) -> (i32, i32) {
    %c0_i32 = arith.constant 0 : i32
    %c0_i32_0 = arith.constant 0 : i32
    %c0_i32_1 = arith.constant 0 : i32
    return %c0_i32, %c0_i32_0 : i32, i32
  }
  func.func @transform_4(%arg0: i32) -> (i32, i32) {
    %c0_i32 = arith.constant 0 : i32
    %c0_i32_0 = arith.constant 0 : i32
    %c0_i32_1 = arith.constant 0 : i32
    return %c0_i32, %c0_i32_0 : i32, i32
  }
  func.func @transform_5(%arg0: i32) -> (i32, i32) {
    %c0_i32 = arith.constant 0 : i32
    %c0_i32_0 = arith.constant 0 : i32
    return %arg0, %c0_i32 : i32, i32
  }
}

</mosaic_0001>

<bundles_post_ra>
// kernel: tpu_custom_call.1
= control target key start
LH: loop header
LB: loop body
LE: loop exit
PB: predicated region body
PF: predicated region fallthrough
CT: control target
= control target key end

     0   :  { %10 = vsyncpa [#allocation4], 0  ;;  %s860_s0 = inlined_call_operand.vmem [shape: f32[16,32], index: 0, kind: input, shape index: {}]   ;;  %s861_s1 = inlined_call_operand.vmem [shape: bf16[32,128], index: 1, kind: input, shape index: {}]   ;;  %s862_s2 = inlined_call_operand.vmem [shape: f32[1,128], index: 2, kind: input, shape index: {}]   ;;  %s863_s3 = inlined_call_operand.vmem [shape: bf16[128,32], index: 3, kind: input, shape index: {}]   ;;  %s864_s4 = inlined_call_operand.vmem [shape: f32[1,32], index: 4, kind: input, shape index: {}]   ;;  %s865_s5 = inlined_call_operand.hbm [shape: f32[16,32], index: 5, kind: output, shape index: {}]  }
   0x1   :  { %12 = vsyncpa [#allocation4 + $0x1], 0  ;;  %s718_s18 = smov 0   ;;  %s720_s19 = smov 0  }
   0x2   :  { %s722_s20 = smov 0   ;;  %s724_s21 = smov 0  }
   0x3 LB: > { %s739_s22 = sadd.s32 4294967295, %s683_s21   ;;  %s501_s23 = sadd.s32 4294967294, %s683_s21   ;;  %s683_s21 = sphi %s724_s21, %s871_s21   ;;  %s679_s20 = sphi %s722_s20, %s870_s20   ;;  %s675_s19 = sphi %s720_s19, %s869_s19   ;;  %s671_s18 = sphi %s718_s18, %s868_s18  }
   0x4   : > { %s743_s24 = sadd.s32 1, %s683_s21   ;;  %s135_s25 = sadd.s32 1, %s679_s20 }
   0x5   : > { %s132_s26 = ssub.s32 %s683_s21, %s743_s24  ;;  %p145_p0 = scmp.ne.s32.totalorder %s679_s20, %s675_s19 }
   0x6   : > { %p133_p1 = scmp.eq.s32.totalorder %s132_s26, 0  ;;  %p146_p2 = scmp.eq.s32.totalorder %s739_s22, 1 }
   0x7   : > { %p151_p3 = scmp.ne.s32.totalorder %s675_s19, %s671_s18  ;;  %p152_p4 = scmp.eq.s32.totalorder %s501_s23, 1 }
   0x8   : > { %s754_s27 = scalar_select %p133_p1, %s679_s20, %s135_s25  }
   0x9   : > { %p756_p5 = por %p146_p2, %p145_p0  ;;  %p760_p6 = por %p152_p4, %p151_p3 }
   0xa   : > { %p504_p7 = scmp.ge.s32.totalorder %s683_s21, 1  ;;  %p189_p8 = scmp.lt.s32.totalorder %s683_s21, 3 }
   0xc   : > { %p190_p9 = pnand %p504_p7, %p189_p8 }
   0xd   : > { %p216_p10 = scmp.lt.s32.totalorder (!%p190_p9), %s739_s22, 1  ;;  %vm222_vm0 = vcmask (!%p190_p9), 261120   ;;  %v605_v7 = vld [vmem:[%s861_s1] sm:$0xff] (!%p190_p9)   ;;  %v685_v8 = vmov (!%p190_p9), 0.0   ;;  %vm686_vm1 = vmmov (!%p190_p9), 0   ;;  %v606_v9 = vld [vmem:[%s861_s1 + $0x8] sm:$0xff] (!%p190_p9)  }
   0xe   : > { %193 = sbr.rel (%p190_p9) target bundleno = 819 (0x333), region = 40  ;;  %536 = vmatprep.subr.bf16.mxu0 (!%p190_p9), %v685_v8  ;;  %540 = vmatprep.mubr.msk.bf16.mxu0 (!%p190_p9), %vm686_vm1, %v685_v8  ;;  %v607_v16 = vld [vmem:[%s863_s3] sm:$0xff] (!%p190_p9)   ;;  %v608_v17 = vld [vmem:[%s863_s3 + $0x8] sm:$0xff] (!%p190_p9)   ;;  %v609_v18 = vld [vmem:[%s863_s3 + $0x10] sm:$0xff] (!%p190_p9)   ;;  %s213_s23 = sand.u32 (!%p190_p9), 1, %s675_s19  }
   0xf   : > { %537 = vmatpush3.bf16.msra.mxu0 (!%p190_p9), %v605_v7  ;;  %544 = vmatprep.subr.bf16.mxu1 (!%p190_p9), %v685_v8  ;;  %v610_v19 = vld [vmem:[%s863_s3 + $0x18] sm:$0xff] (!%p190_p9)   ;;  %v611_v20 = vld [vmem:[%s863_s3 + $0x20] sm:$0xff] (!%p190_p9)   ;;  %v612_v21 = vld [vmem:[%s863_s3 + $0x28] sm:$0xff] (!%p190_p9)   ;;  %s505_s25 = sshll.u32 (!%p190_p9), %s213_s23, 3  ;;  %s521_s26 = sshll.u32 (!%p190_p9), %s739_s22, 7 }
  0x10   : > { %538 = vmatprep.subr.bf16.mxu0 (!%p190_p9), %v685_v8  ;;  %560 = vmatprep.mubr.msk.bf16.mxu1 (!%p190_p9), %vm686_vm1, %v685_v8  ;;  %v613_v22 = vld [vmem:[%s863_s3 + $0x30] sm:$0xff] (!%p190_p9)   ;;  %v614_v23 = vld [vmem:[%s863_s3 + $0x38] sm:$0xff] (!%p190_p9)   ;;  %v507_v24 = vld [vmem:[%s864_s4] ss:$0 sm:$0xff] (!%p190_p9)  ;;  %s429_s10 = scalar_lea.sflag (!%p190_p9), [#allocation4], %s213_s23 }
  0x11   : > { %545 = vmatpush3.bf16.msra.mxu1 (!%p190_p9), %v607_v16  ;;  %245 = vst.msk [vmem:[#allocation2] sm:$0xff] (!%p190_p9), %vm222_vm0, %v507_v24  ;;  %v508_v25 = vld [vmem:[%s862_s2] ss:$0 sm:$0xff] (!%p190_p9) }
  0x12   : > { %546 = vmatprep.subr.bf16.mxu1 (!%p190_p9), %v685_v8 }
  0x13   : > { %539 = vmatpush3.bf16.msra.mxu0 (!%p190_p9), %v606_v9 }
  0x15   : > { %s217_s30 = scalar_select %p216_p10, %s739_s22, 1  ;;  %547 = vmatpush3.bf16.msra.mxu1 %v608_v17 }
  0x16   : > { %548 = vmatprep.subr.bf16.mxu1 %v685_v8  ;;  %s687_s22 = smov [#allocation3]  }
  0x17   : > { %s506_s6 = sshll.u32 %s217_s30, 3  ;;  %s215_s30 = scalar_lea.vmem [#allocation3], %s505_s25 }
  0x18   : > { %s219_s9 = scalar_lea.vmem %s860_s0, %s506_s6  ;;  %v318_v38 = vld [vmem:[#allocation2] sm:$0xff]  ;;  %s442_s6 = sshll.u32 %s215_s30, 4  ;;  %s819_s6 = int_to_ptr.vmem [resolvable:$true] %s442_s6 }
  0x19   : > { %v221_v0 = vld [vmem:[%s219_s9] sm:$0xff]  ;;  %549 = vmatpush3.bf16.msra.mxu1 %v609_v18  ;;  %s817_s9 = scalar_lea.hbm %s865_s5, %s521_s26  ;;  %s621_s11 = scalar_lea.vmem %s819_s6, 128 }
  0x1a   : > { %v223_v1 = vsel %vm222_vm0, %v221_v0, 0.0  ;;  %550 = vmatprep.subr.bf16.mxu1 %v685_v8  ;;  %p622_p11 = scmp.ne.s32.totalorder %s819_s6, %s621_s11  ;;  %s625_s12 = sshll.u32 %s687_s22, 4  ;;  %s626_s12 = int_to_ptr.vmem [resolvable:$false] %s625_s12 }
  0x1b   : > { %224 = vadd.xlane.f32.xlu0 %v223_v1  ;;  %s627_s13 = scalar_lea.vmem %s626_s12, 256  ;;  %p628_p0 = scmp.lt.s32.totalorder %s819_s6, %s626_s12 }
  0x1c   : > { %p623_p12 = pnand %p622_p11, %p756_p5  ;;  %p629_p1 = scmp.lt.s32.totalorder %s627_s13, %s621_s11 }
  0x1d   : > { %551 = vmatpush3.bf16.msra.mxu1 %v610_v19 }
  0x1e   : > { %552 = vmatprep.subr.bf16.mxu1 %v685_v8  ;;  %p624_p13 = pneg %p623_p12  ;;  %p630_p2 = por %p629_p1, %p628_p0 }
  0x20   : > { %p631_p3 = pnand %p630_p2, %p624_p13 }
  0x21   : > { %553 = vmatpush3.bf16.msra.mxu1 %v611_v20 }
  0x22   : > { %554 = vmatprep.subr.bf16.mxu1 %v685_v8 }
  0x25   : > { %555 = vmatpush3.bf16.msra.mxu1 %v612_v21 }
  0x26   : > { %556 = vmatprep.subr.bf16.mxu1 %v685_v8 }
  0x29   : > { %557 = vmatpush3.bf16.msra.mxu1 %v613_v22 }
  0x2a   : > { %558 = vmatprep.subr.bf16.mxu1 %v685_v8 }
  0x2d   : > { %559 = vmatpush3.bf16.msra.mxu1 %v614_v23 }
  0xa8   : > { %v225_v2 = vpop.xlane.xlu0 %224 }
  0xa9   : > { %v227_v3 = vmul.f32 0.03125, %v225_v2 }
  0xab   : > { %v228_v4 = vsub.f32 %v221_v0, %v227_v3 }
  0xad   : > { %v229_v5 = vmul.f32 %v228_v4, %v228_v4 }
  0xaf   : > { %v230_v6 = vsel %vm222_vm0, %v229_v5, 0.0 }
  0xb0   : > { %231 = vadd.xlane.f32.xlu0 %v230_v6 }
 0x13d   : > { %v232_v10 = vpop.xlane.xlu0 %231 }
 0x13e   : > { %v233_v11 = vmul.f32 0.03125, %v232_v10 }
 0x140   : > { %v234_v12 = vadd.f32 1e-05, %v233_v11 }
 0x142   : > { %615 = vrsqrt.f32 %v234_v12 }
 0x14c   : > { %v616_v13 = vpop.eup %615 }
 0x14d   : > { %v236_v14 = vmul.f32 %v616_v13, %v228_v4 }
 0x14f   : > { %v237_v15 = vpack.c.bf16 %v236_v14, %v236_v14 }
 0x151   : > { %541 = vmatmul.mubr.msk.bf16.vlgmr.msra.gmra.mrb[0].mxu0 %vm222_vm0, %v237_v15 }
 0x224   : > { %v306_v26 = vpop.f32.mrb[0].mxu0 }
 0x225   : > { %v307_v27 = vadd.f32 %v508_v25, %v306_v26  ;;  %v542_v28 = vpop.f32.mrb[1].mxu0 }
 0x226   : > { %v309_v29 = vpop.f32.mrb[2].mxu0 }
 0x227   : > { %v312_v30 = vsub.f32 0.0, %v307_v27  ;;  %v543_v31 = vpop.f32.mrb[3].mxu0 }
 0x229   : > { %v313_v32 = vmul.f32 1.442695, %v312_v30 }
 0x22b   : > { %617 = vpow2.f32 %v313_v32 }
 0x235   : > { %v618_v33 = vpop.eup %617 }
 0x236   : > { %v315_v34 = vadd.f32 1.0, %v618_v33 }
 0x238   : > { %619 = vrcp.f32 %v315_v34 }
 0x242   : > { %v620_v35 = vpop.eup %619 }
 0x243   : > { %v317_v36 = vmul.f32 %v620_v35, %v307_v27 }
 0x245   : > { %v319_v37 = vpack.c.bf16 %v317_v36, %v317_v36 }
 0x247   : > { %561 = vmatmul.mubr.bf16.vlgmr.msra.gmra.mrb[0].mxu1 %v319_v37 }
 0x31a   : > { %v418_v39 = vpop.f32.mrb[0].mxu1 }
 0x31b   : > { %v424_v40 = vadd.f32 %v418_v39, %v318_v38  ;;  %v562_v41 = vpop.f32.mrb[1].mxu1 }
 0x31c   : > { %v421_v42 = vpop.f32.mrb[2].mxu1 }
 0x31d   : > { %425 = vst.msk [vmem:[#allocation2] sm:$0xff] %vm222_vm0, %v424_v40  ;;  %v563_v43 = vpop.f32.mrb[3].mxu1 }
 0x324   : > { %v426_v44 = vld [vmem:[#allocation2] sm:$0xff] }
 0x325   : > { %427 = vst.msk [vmem:[%s215_s30] sm:$0xff] %vm222_vm0, %v426_v44 }
 0x326   : > { %634 = shalt.err (!%p631_p3)
}
 0x327   : > { %s635_s14 = scalar_lea.hbm %s817_s9, 128  ;;  %s639_s17 = scalar_lea.hbm %s865_s5, 256 }
 0x328   : > { %p636_p4 = scmp.ne.s32.totalorder %s817_s9, %s635_s14  ;;  %p640_p9 = scmp.lt.u32.totalorder %s817_s9, %s865_s5 }
 0x329   : > { %p641_p10 = scmp.lt.u32.totalorder %s639_s17, %s635_s14  ;;  %p643_p12 = scmp.lt.u32.totalorder %s635_s14, %s817_s9 }
 0x32a   : > { %p637_p7 = pnand %p636_p4, %p756_p5 }
 0x32b   : > { %p642_p11 = por %p641_p10, %p640_p9 }
 0x32c   : > { %p638_p8 = pneg %p637_p7 }
 0x32d   : > { %p644_p13 = por %p643_p12, %p642_p11 }
 0x32f   : > { %p645_p0 = pnand %p644_p13, %p638_p8 }
 0x331   : > { %648 = shalt.err (!%p645_p0)
}
 0x332   : > { %564 = dma.vmem_to_hbm [thread:$0]  (%p756_p5), %s819_s6, 128, %s817_s9, %s429_s10  }
 0x333 PF: > { %p570_p1 = scmp.ge.s32.totalorder %s683_s21, 2  ;;  %s454_s26 = sand.u32 1, %s671_s18  }
 0x334   : > { %s455_s30 = scalar_lea.sflag [#allocation4], %s454_s26 }
 0x335   : > { %p567_p2 = pnand %p570_p1, %p760_p6 }
 0x337   : > { %666 = dma.done.wait (!%p567_p2), %s455_s30, 128  }
 0x338   : > { %668 = vsyncadd (!%p567_p2), %s455_s30, 4294967168  ;;  %p15_p3 = scmp.ge.s32.totalorder %s743_s24, 4   ;;  %s868_s18 = smov %s675_s19 }
 0x339   : > { %s869_s19 = smov %s679_s20  ;;  %s870_s20 = smov %s754_s27 }
 0x33a   : > { %s871_s21 = smov %s743_s24  ;;  %17 = sbr.rel (!%p15_p3) target bundleno = 3 (0x3), region = 75 }
 0x341   :  { %460 = vsyncpa [#allocation4], 1 }
 0x342   :  { %462 = vsyncpa [#allocation4 + $0x1], 1 }

</bundles_post_ra>
